<compile_context>
chip_gen: v7x
topology: tpu7x:2x2x1
jax: 0.10.0
libtpu: 0.0.40
codegen_flags: <defaults>
</compile_context>

<pallas_src>
import math

import jax
import jax.numpy as jnp
import numpy as np
from jax.experimental import pallas as pl
from jax.experimental.pallas import tpu as pltpu


def _round_up(x, m):
    return (x + m - 1) // m * m


def _gelu_erf(x):
    """Exact-erf GELU (nn.GELU() default) via A&S 7.1.26 (|err| ~ 1.5e-7).

    Division-free: 1/(1+p*z) uses the EUP approximate reciprocal refined by one
    Newton step (post-refinement rel. error ~eps^2, far below f32 tolerance).
    Sign select folded:  1 + erf(x/sqrt(2)) = 2 - q (x>=0),  q (x<0),
    with q = P(t) * exp(-x^2/2).
    """
    c = np.float32(0.7071067811865476)
    p = np.float32(0.3275911)
    a1 = np.float32(0.254829592)
    a2 = np.float32(-0.284496736)
    a3 = np.float32(1.421413741)
    a4 = np.float32(-1.453152027)
    a5 = np.float32(1.061405429)

    z = jnp.abs(x) * c
    d = 1.0 + p * z
    r = pl.reciprocal(d, approx=True)          # EUP slot (free next to VALU work)
    t = r * (2.0 - d * r)                      # one Newton step -> ~f32-exact 1/d
    poly = ((((a5 * t + a4) * t + a3) * t + a2) * t + a1) * t
    q = poly * jnp.exp(np.float32(-0.5) * x * x)   # = P(t) * exp(-z^2), exp on EUP
    one_plus_erf = jnp.where(x >= 0, 2.0 - q, q)
    return 0.5 * x * one_plus_erf


def _mlp_kernel(x_ref, w1_ref, b1_ref, w2_ref, b2_ref, o_ref):
    # x_ref: (tm, Din); w1: (Din, H); b1: (1, H); w2: (H, Dout); b2: (1, Dout)
    # o_ref: (tm // k, k * Dout) -- lane-dense packed view of the (tm, Dout) tile.
    x = x_ref[...]
    h = jnp.dot(x, w1_ref[...], preferred_element_type=jnp.float32) + b1_ref[...]
    h = _gelu_erf(h)
    # TODO(synk): nn.Dropout(p=0.2) is identity in eval mode; training-mode RNG
    # masking (pltpu.prng_seed / prng_random_bits) is intentionally not applied.
    o = jnp.dot(h.astype(w2_ref.dtype), w2_ref[...],
                preferred_element_type=jnp.float32) + b2_ref[...]
    o_ref[...] = o.reshape(o_ref.shape).astype(o_ref.dtype)


def mlp_block(x, w1, b1, w2, b2, *, tile_m=512):
    """Fused Linear -> GELU -> Dropout(eval) -> Linear.  x: (..., input_dim)."""
    din, hidden = w1.shape
    dout = w2.shape[1]
    assert x.shape[-1] == din and w2.shape[0] == hidden
    assert b1.shape == (hidden,) and b2.shape == (dout,)
    lead = x.shape[:-1]

    xm = x.reshape(-1, din)
    m = xm.shape[0]

    # Lane-dense output packing factor: kernel sees the output as (M/k, k*dout)
    # with k*dout == 128 so stores are full-width.
    k = 128 // dout if (dout < 128 and 128 % dout == 0) else 1

    # Grid/tile selection: pick the step count first, then an aligned per-step
    # row count -> padding is bounded by the alignment, not by tile_m.
    g = max(1, pl.cdiv(m, tile_m))
    if g == 1:
        align = (8 * k) // math.gcd(8, k)      # lcm(8, k): out block is full-dim
    else:
        align = 8 * k                          # packed out sublane dim must be %8
    tm = _round_up(pl.cdiv(m, g), align)
    mp = g * tm

    if mp != m:
        xm = jnp.pad(xm, ((0, mp - m), (0, 0)))

    b1_2d = b1.reshape(1, hidden)
    b2_2d = b2.reshape(1, dout)

    itemsize = np.dtype(x.dtype).itemsize
    cost = pl.CostEstimate(
        flops=2 * mp * din * hidden + 2 * mp * hidden * dout,
        transcendentals=2 * mp * hidden,       # exp + approx-recip per GELU element
        bytes_accessed=(mp * din + w1.size + b1.size + w2.size + b2.size
                        + mp * dout) * itemsize,
    )

    # Per-generation VMEM budget (~96 MiB on v5e/v6e, ~48 MiB on v7x).
    try:
        cap = pltpu.get_tpu_info().vmem_capacity_bytes
        vmem_limit = min(int(cap * 3 // 4), 100 * 1024 * 1024)
    except Exception:
        vmem_limit = 32 * 1024 * 1024

    def build(single_buffer_weights, kk):
        def wspec(shape):
            if single_buffer_weights:
                # Grid-invariant -> never revisited -> one buffer suffices;
                # halves weight VMEM residency (matters for big H on v7x).
                return pl.BlockSpec(shape, lambda i: (0, 0),
                                    pipeline_mode=pl.Buffered(1))
            return pl.BlockSpec(shape, lambda i: (0, 0))

        return pl.pallas_call(
            _mlp_kernel,
            out_shape=jax.ShapeDtypeStruct((mp // kk, kk * dout), x.dtype),
            grid_spec=pltpu.PrefetchScalarGridSpec(
                num_scalar_prefetch=0,
                grid=(g,),
                in_specs=[
                    pl.BlockSpec((tm, din), lambda i: (i, 0)),   # x row tile
                    wspec((din, hidden)),                        # W1 (grid-invariant)
                    wspec((1, hidden)),                          # b1
                    wspec((hidden, dout)),                       # W2
                    wspec((1, dout)),                            # b2
                ],
                out_specs=pl.BlockSpec((tm // kk, kk * dout), lambda i: (i, 0)),
            ),
            compiler_params=pltpu.CompilerParams(
                dimension_semantics=("parallel",),   # M tiles shard across TCs (v7x)
                vmem_limit_bytes=vmem_limit,
            ),
            cost_estimate=cost,
        )

    args = (xm, w1, b1_2d, w2, b2_2d)
    # Preferred config first; degrade gracefully if a knob is unsupported so the
    # kernel always compiles and runs.
    out = None
    last_err = None
    for single_buf, kk in ((True, k), (False, k), (False, 1)):
        try:
            out = build(single_buf, kk)(*args)
            break
        except Exception as e:                      # lowering / API fallback only
            last_err = e
    if out is None:
        raise last_err

    out = out.reshape(mp, dout)                     # free row-major view
    if mp != m:
        out = out[:m]
    return out.reshape(*lead, dout)


def _ref_forward(x, w1, b1, w2, b2):
    # Pure-JAX reference mirroring PyTorch MLP_Block in eval mode
    # (nn.GELU() default = exact erf; Dropout = identity).
    h = jnp.dot(x, w1, precision=jax.lax.Precision.HIGHEST) + b1
    h = jax.nn.gelu(h, approximate=False)
    return jnp.dot(h, w2, precision=jax.lax.Precision.HIGHEST) + b2


if __name__ == "__main__":
    key = jax.random.PRNGKey(0)
    batch, seq, input_dim = 2, 8, 32
    hidden_dim_ratio, output_dim = 4, 32
    hidden_dim = input_dim * hidden_dim_ratio      # 128 -> lane-aligned

    kx, k1, k2, k3, k4 = jax.random.split(key, 5)
    x = jax.random.normal(kx, (batch, seq, input_dim), dtype=jnp.float32)
    w1 = jax.random.normal(k1, (input_dim, hidden_dim), jnp.float32) / np.sqrt(input_dim)
    b1 = jax.random.normal(k2, (hidden_dim,), jnp.float32) * 0.1
    w2 = jax.random.normal(k3, (hidden_dim, output_dim), jnp.float32) / np.sqrt(hidden_dim)
    b2 = jax.random.normal(k4, (output_dim,), jnp.float32) * 0.1

    out = mlp_block(x, w1, b1, w2, b2)
    jax.block_until_ready(out)

    ref = _ref_forward(x, w1, b1, w2, b2)
    assert out.shape == (batch, seq, output_dim)
    np.testing.assert_allclose(np.asarray(out), np.asarray(ref),
                               rtol=2e-5, atol=2e-5)
    print("KERNEL_OK")
</pallas_src>

<mosaic_0001>
module attributes {stable_mosaic.version = 11 : i64} {
  func.func @_mlp_kernel(%arg0: i32, %arg1: memref<16x32xf32, #tpu.memory_space<vmem>>, %arg2: memref<32x128xf32, #tpu.memory_space<vmem>>, %arg3: memref<1x128xf32, #tpu.memory_space<vmem>>, %arg4: memref<128x32xf32, #tpu.memory_space<vmem>>, %arg5: memref<1x32xf32, #tpu.memory_space<vmem>>, %arg6: memref<4x128xf32, #tpu.memory_space<vmem>>) attributes {dimension_semantics = [#tpu.dimension_semantics<parallel>], iteration_bounds = array<i64: 1>, scalar_prefetch = 0 : i64, scratch_operands = 0 : i64, tpu.core_type = #tpu.core_type<tc>, window_params = [{transform_indices = @transform_0, window_bounds = array<i64: 16, 32>}, {pipeline_mode = #tpu.pipeline_mode<synchronous>, transform_indices = @transform_1, window_bounds = array<i64: 32, 128>}, {pipeline_mode = #tpu.pipeline_mode<synchronous>, transform_indices = @transform_2, window_bounds = array<i64: 1, 128>}, {pipeline_mode = #tpu.pipeline_mode<synchronous>, transform_indices = @transform_3, window_bounds = array<i64: 128, 32>}, {pipeline_mode = #tpu.pipeline_mode<synchronous>, transform_indices = @transform_4, window_bounds = array<i64: 1, 32>}, {transform_indices = @transform_5, window_bounds = array<i64: 4, 128>}]} {
    %c0 = arith.constant 0 : index
    %c0_0 = arith.constant 0 : index
    %0 = vector.load %arg1[%c0, %c0_0] : memref<16x32xf32, #tpu.memory_space<vmem>>, vector<16x32xf32>
    %c0_1 = arith.constant 0 : index
    %c0_2 = arith.constant 0 : index
    %1 = vector.load %arg2[%c0_1, %c0_2] : memref<32x128xf32, #tpu.memory_space<vmem>>, vector<32x128xf32>
    %cst = arith.constant dense<0.000000e+00> : vector<16x128xf32>
    %2 = tpu.matmul %0, %1, %cst {dimension_numbers = #tpu.dot_dimension_numbers<[1], [0], [0], [1], [0, 0, 1, 1], [], []>} : vector<16x32xf32>, vector<32x128xf32>, vector<16x128xf32> -> vector<16x128xf32>
    %c0_3 = arith.constant 0 : index
    %c0_4 = arith.constant 0 : index
    %3 = vector.load %arg3[%c0_3, %c0_4] : memref<1x128xf32, #tpu.memory_space<vmem>>, vector<1x128xf32>
    %4 = vector.broadcast %3 : vector<1x128xf32> to vector<16x128xf32>
    %5 = arith.addf %2, %4 : vector<16x128xf32>
    %6 = math.absf %5 : vector<16x128xf32>
    %cst_5 = arith.constant 0.707106769 : f32
    %7 = vector.broadcast %cst_5 : f32 to vector<16x128xf32>
    %8 = arith.mulf %6, %7 : vector<16x128xf32>
    %cst_6 = arith.constant 0.327591091 : f32
    %9 = vector.broadcast %cst_6 : f32 to vector<16x128xf32>
    %10 = arith.mulf %9, %8 : vector<16x128xf32>
    %cst_7 = arith.constant 1.000000e+00 : f32
    %11 = vector.broadcast %cst_7 : f32 to vector<16x128xf32>
    %12 = arith.addf %11, %10 : vector<16x128xf32>
    %13 = tpu.reciprocal %12 {approx = true} : vector<16x128xf32> -> vector<16x128xf32>
    %14 = arith.mulf %12, %13 : vector<16x128xf32>
    %cst_8 = arith.constant 2.000000e+00 : f32
    %15 = vector.broadcast %cst_8 : f32 to vector<16x128xf32>
    %16 = arith.subf %15, %14 : vector<16x128xf32>
    %17 = arith.mulf %13, %16 : vector<16x128xf32>
    %cst_9 = arith.constant 1.06140542 : f32
    %18 = vector.broadcast %cst_9 : f32 to vector<16x128xf32>
    %19 = arith.mulf %18, %17 : vector<16x128xf32>
    %cst_10 = arith.constant -1.45315206 : f32
    %20 = vector.broadcast %cst_10 : f32 to vector<16x128xf32>
    %21 = arith.addf %19, %20 : vector<16x128xf32>
    %22 = arith.mulf %21, %17 : vector<16x128xf32>
    %cst_11 = arith.constant 1.42141378 : f32
    %23 = vector.broadcast %cst_11 : f32 to vector<16x128xf32>
    %24 = arith.addf %22, %23 : vector<16x128xf32>
    %25 = arith.mulf %24, %17 : vector<16x128xf32>
    %cst_12 = arith.constant -0.284496725 : f32
    %26 = vector.broadcast %cst_12 : f32 to vector<16x128xf32>
    %27 = arith.addf %25, %26 : vector<16x128xf32>
    %28 = arith.mulf %27, %17 : vector<16x128xf32>
    %cst_13 = arith.constant 0.254829586 : f32
    %29 = vector.broadcast %cst_13 : f32 to vector<16x128xf32>
    %30 = arith.addf %28, %29 : vector<16x128xf32>
    %31 = arith.mulf %30, %17 : vector<16x128xf32>
    %cst_14 = arith.constant -5.000000e-01 : f32
    %32 = vector.broadcast %cst_14 : f32 to vector<16x128xf32>
    %33 = arith.mulf %32, %5 : vector<16x128xf32>
    %34 = arith.mulf %33, %5 : vector<16x128xf32>
    %35 = math.exp %34 : vector<16x128xf32>
    %36 = arith.mulf %31, %35 : vector<16x128xf32>
    %cst_15 = arith.constant 0.000000e+00 : f32
    %37 = vector.broadcast %cst_15 : f32 to vector<16x128xf32>
    %38 = arith.cmpf oge, %5, %37 : vector<16x128xf32>
    %cst_16 = arith.constant 2.000000e+00 : f32
    %39 = vector.broadcast %cst_16 : f32 to vector<16x128xf32>
    %40 = arith.subf %39, %36 : vector<16x128xf32>
    %41 = arith.select %38, %40, %36 : vector<16x128xi1>, vector<16x128xf32>
    %cst_17 = arith.constant 5.000000e-01 : f32
    %42 = vector.broadcast %cst_17 : f32 to vector<16x128xf32>
    %43 = arith.mulf %42, %5 : vector<16x128xf32>
    %44 = arith.mulf %43, %41 : vector<16x128xf32>
    %c0_18 = arith.constant 0 : index
    %c0_19 = arith.constant 0 : index
    %45 = vector.load %arg4[%c0_18, %c0_19] : memref<128x32xf32, #tpu.memory_space<vmem>>, vector<128x32xf32>
    %cst_20 = arith.constant dense<0.000000e+00> : vector<16x32xf32>
    %46 = tpu.matmul %44, %45, %cst_20 {dimension_numbers = #tpu.dot_dimension_numbers<[1], [0], [0], [1], [0, 0, 1, 1], [], []>} : vector<16x128xf32>, vector<128x32xf32>, vector<16x32xf32> -> vector<16x32xf32>
    %c0_21 = arith.constant 0 : index
    %c0_22 = arith.constant 0 : index
    %47 = vector.load %arg5[%c0_21, %c0_22] : memref<1x32xf32, #tpu.memory_space<vmem>>, vector<1x32xf32>
    %48 = vector.broadcast %47 : vector<1x32xf32> to vector<16x32xf32>
    %49 = arith.addf %46, %48 : vector<16x32xf32>
    %50 = vector.shape_cast %49 : vector<16x32xf32> to vector<4x128xf32>
    %c0_23 = arith.constant 0 : index
    %c0_24 = arith.constant 0 : index
    %51 = vector.load %arg6[%c0_23, %c0_24] : memref<4x128xf32, #tpu.memory_space<vmem>>, vector<4x128xf32>
    tpu.vector_store %arg6[%c0_23, %c0_24], %50 {strides = array<i32>} : memref<4x128xf32, #tpu.memory_space<vmem>>, vector<4x128xf32>,
    return
  }
  func.func @transform_0(%arg0: i32) -> (i32, i32) {
    %c0_i32 = arith.constant 0 : i32
    %c0_i32_0 = arith.constant 0 : i32
    return %arg0, %c0_i32 : i32, i32
  }
  func.func @transform_1(%arg0: i32) -> (i32, i32) {
    %c0_i32 = arith.constant 0 : i32
    %c0_i32_0 = arith.constant 0 : i32
    %c0_i32_1 = arith.constant 0 : i32
    return %c0_i32, %c0_i32_0 : i32, i32
  }
  func.func @transform_2(%arg0: i32) -> (i32, i32) {
    %c0_i32 = arith.constant 0 : i32
    %c0_i32_0 = arith.constant 0 : i32
    %c0_i32_1 = arith.constant 0 : i32
    return %c0_i32, %c0_i32_0 : i32, i32
  }
  func.func @transform_3(%arg0: i32) -> (i32, i32) {
    %c0_i32 = arith.constant 0 : i32
    %c0_i32_0 = arith.constant 0 : i32
    %c0_i32_1 = arith.constant 0 : i32
    return %c0_i32, %c0_i32_0 : i32, i32
  }
  func.func @transform_4(%arg0: i32) -> (i32, i32) {
    %c0_i32 = arith.constant 0 : i32
    %c0_i32_0 = arith.constant 0 : i32
    %c0_i32_1 = arith.constant 0 : i32
    return %c0_i32, %c0_i32_0 : i32, i32
  }
  func.func @transform_5(%arg0: i32) -> (i32, i32) {
    %c0_i32 = arith.constant 0 : i32
    %c0_i32_0 = arith.constant 0 : i32
    return %arg0, %c0_i32 : i32, i32
  }
}

module attributes {stable_mosaic.version = 11 : i64} {
  func.func @_mlp_kernel(%arg0: i32, %arg1: memref<16x32xf32, #tpu.memory_space<vmem>>, %arg2: memref<32x128xf32, #tpu.memory_space<vmem>>, %arg3: memref<1x128xf32, #tpu.memory_space<vmem>>, %arg4: memref<128x32xf32, #tpu.memory_space<vmem>>, %arg5: memref<1x32xf32, #tpu.memory_space<vmem>>, %arg6: memref<4x128xf32, #tpu.memory_space<vmem>>) attributes {dimension_semantics = [#tpu.dimension_semantics<parallel>], iteration_bounds = array<i64: 1>, scalar_prefetch = 0 : i64, scratch_operands = 0 : i64, tpu.core_type = #tpu.core_type<tc>, window_params = [{transform_indices = @transform_0, window_bounds = array<i64: 16, 32>}, {pipeline_mode = #tpu.pipeline_mode<synchronous>, transform_indices = @transform_1, window_bounds = array<i64: 32, 128>}, {pipeline_mode = #tpu.pipeline_mode<synchronous>, transform_indices = @transform_2, window_bounds = array<i64: 1, 128>}, {pipeline_mode = #tpu.pipeline_mode<synchronous>, transform_indices = @transform_3, window_bounds = array<i64: 128, 32>}, {pipeline_mode = #tpu.pipeline_mode<synchronous>, transform_indices = @transform_4, window_bounds = array<i64: 1, 32>}, {transform_indices = @transform_5, window_bounds = array<i64: 4, 128>}]} {
    %c0 = arith.constant 0 : index
    %c0_0 = arith.constant 0 : index
    %0 = vector.load %arg1[%c0, %c0_0] : memref<16x32xf32, #tpu.memory_space<vmem>>, vector<16x32xf32>
    %c0_1 = arith.constant 0 : index
    %c0_2 = arith.constant 0 : index
    %1 = vector.load %arg2[%c0_1, %c0_2] : memref<32x128xf32, #tpu.memory_space<vmem>>, vector<32x128xf32>
    %cst = arith.constant dense<0.000000e+00> : vector<16x128xf32>
    %2 = tpu.matmul %0, %1, %cst {dimension_numbers = #tpu.dot_dimension_numbers<[1], [0], [0], [1], [0, 0, 1, 1], [], []>} : vector<16x32xf32>, vector<32x128xf32>, vector<16x128xf32> -> vector<16x128xf32>
    %c0_3 = arith.constant 0 : index
    %c0_4 = arith.constant 0 : index
    %3 = vector.load %arg3[%c0_3, %c0_4] : memref<1x128xf32, #tpu.memory_space<vmem>>, vector<1x128xf32>
    %4 = vector.broadcast %3 : vector<1x128xf32> to vector<16x128xf32>
    %5 = arith.addf %2, %4 : vector<16x128xf32>
    %6 = math.absf %5 : vector<16x128xf32>
    %cst_5 = arith.constant 0.707106769 : f32
    %7 = vector.broadcast %cst_5 : f32 to vector<16x128xf32>
    %8 = arith.mulf %6, %7 : vector<16x128xf32>
    %cst_6 = arith.constant 0.327591091 : f32
    %9 = vector.broadcast %cst_6 : f32 to vector<16x128xf32>
    %10 = arith.mulf %9, %8 : vector<16x128xf32>
    %cst_7 = arith.constant 1.000000e+00 : f32
    %11 = vector.broadcast %cst_7 : f32 to vector<16x128xf32>
    %12 = arith.addf %11, %10 : vector<16x128xf32>
    %13 = tpu.reciprocal %12 {approx = true} : vector<16x128xf32> -> vector<16x128xf32>
    %14 = arith.mulf %12, %13 : vector<16x128xf32>
    %cst_8 = arith.constant 2.000000e+00 : f32
    %15 = vector.broadcast %cst_8 : f32 to vector<16x128xf32>
    %16 = arith.subf %15, %14 : vector<16x128xf32>
    %17 = arith.mulf %13, %16 : vector<16x128xf32>
    %cst_9 = arith.constant 1.06140542 : f32
    %18 = vector.broadcast %cst_9 : f32 to vector<16x128xf32>
    %19 = arith.mulf %18, %17 : vector<16x128xf32>
    %cst_10 = arith.constant -1.45315206 : f32
    %20 = vector.broadcast %cst_10 : f32 to vector<16x128xf32>
    %21 = arith.addf %19, %20 : vector<16x128xf32>
    %22 = arith.mulf %21, %17 : vector<16x128xf32>
    %cst_11 = arith.constant 1.42141378 : f32
    %23 = vector.broadcast %cst_11 : f32 to vector<16x128xf32>
    %24 = arith.addf %22, %23 : vector<16x128xf32>
    %25 = arith.mulf %24, %17 : vector<16x128xf32>
    %cst_12 = arith.constant -0.284496725 : f32
    %26 = vector.broadcast %cst_12 : f32 to vector<16x128xf32>
    %27 = arith.addf %25, %26 : vector<16x128xf32>
    %28 = arith.mulf %27, %17 : vector<16x128xf32>
    %cst_13 = arith.constant 0.254829586 : f32
    %29 = vector.broadcast %cst_13 : f32 to vector<16x128xf32>
    %30 = arith.addf %28, %29 : vector<16x128xf32>
    %31 = arith.mulf %30, %17 : vector<16x128xf32>
    %cst_14 = arith.constant -5.000000e-01 : f32
    %32 = vector.broadcast %cst_14 : f32 to vector<16x128xf32>
    %33 = arith.mulf %32, %5 : vector<16x128xf32>
    %34 = arith.mulf %33, %5 : vector<16x128xf32>
    %35 = math.exp %34 : vector<16x128xf32>
    %36 = arith.mulf %31, %35 : vector<16x128xf32>
    %cst_15 = arith.constant 0.000000e+00 : f32
    %37 = vector.broadcast %cst_15 : f32 to vector<16x128xf32>
    %38 = arith.cmpf oge, %5, %37 : vector<16x128xf32>
    %cst_16 = arith.constant 2.000000e+00 : f32
    %39 = vector.broadcast %cst_16 : f32 to vector<16x128xf32>
    %40 = arith.subf %39, %36 : vector<16x128xf32>
    %41 = arith.select %38, %40, %36 : vector<16x128xi1>, vector<16x128xf32>
    %cst_17 = arith.constant 5.000000e-01 : f32
    %42 = vector.broadcast %cst_17 : f32 to vector<16x128xf32>
    %43 = arith.mulf %42, %5 : vector<16x128xf32>
    %44 = arith.mulf %43, %41 : vector<16x128xf32>
    %c0_18 = arith.constant 0 : index
    %c0_19 = arith.constant 0 : index
    %45 = vector.load %arg4[%c0_18, %c0_19] : memref<128x32xf32, #tpu.memory_space<vmem>>, vector<128x32xf32>
    %cst_20 = arith.constant dense<0.000000e+00> : vector<16x32xf32>
    %46 = tpu.matmul %44, %45, %cst_20 {dimension_numbers = #tpu.dot_dimension_numbers<[1], [0], [0], [1], [0, 0, 1, 1], [], []>} : vector<16x128xf32>, vector<128x32xf32>, vector<16x32xf32> -> vector<16x32xf32>
    %c0_21 = arith.constant 0 : index
    %c0_22 = arith.constant 0 : index
    %47 = vector.load %arg5[%c0_21, %c0_22] : memref<1x32xf32, #tpu.memory_space<vmem>>, vector<1x32xf32>
    %48 = vector.broadcast %47 : vector<1x32xf32> to vector<16x32xf32>
    %49 = arith.addf %46, %48 : vector<16x32xf32>
    %50 = vector.shape_cast %49 : vector<16x32xf32> to vector<4x128xf32>
    %c0_23 = arith.constant 0 : index
    %c0_24 = arith.constant 0 : index
    %51 = vector.load %arg6[%c0_23, %c0_24] : memref<4x128xf32, #tpu.memory_space<vmem>>, vector<4x128xf32>
    tpu.vector_store %arg6[%c0_23, %c0_24], %50 {strides = array<i32>} : memref<4x128xf32, #tpu.memory_space<vmem>>, vector<4x128xf32>,
    return
  }
  func.func @transform_0(%arg0: i32) -> (i32, i32) {
    %c0_i32 = arith.constant 0 : i32
    %c0_i32_0 = arith.constant 0 : i32
    return %arg0, %c0_i32 : i32, i32
  }
  func.func @transform_1(%arg0: i32) -> (i32, i32) {
    %c0_i32 = arith.constant 0 : i32
    %c0_i32_0 = arith.constant 0 : i32
    %c0_i32_1 = arith.constant 0 : i32
    return %c0_i32, %c0_i32_0 : i32, i32
  }
  func.func @transform_2(%arg0: i32) -> (i32, i32) {
    %c0_i32 = arith.constant 0 : i32
    %c0_i32_0 = arith.constant 0 : i32
    %c0_i32_1 = arith.constant 0 : i32
    return %c0_i32, %c0_i32_0 : i32, i32
  }
  func.func @transform_3(%arg0: i32) -> (i32, i32) {
    %c0_i32 = arith.constant 0 : i32
    %c0_i32_0 = arith.constant 0 : i32
    %c0_i32_1 = arith.constant 0 : i32
    return %c0_i32, %c0_i32_0 : i32, i32
  }
  func.func @transform_4(%arg0: i32) -> (i32, i32) {
    %c0_i32 = arith.constant 0 : i32
    %c0_i32_0 = arith.constant 0 : i32
    %c0_i32_1 = arith.constant 0 : i32
    return %c0_i32, %c0_i32_0 : i32, i32
  }
  func.func @transform_5(%arg0: i32) -> (i32, i32) {
    %c0_i32 = arith.constant 0 : i32
    %c0_i32_0 = arith.constant 0 : i32
    return %arg0, %c0_i32 : i32, i32
  }
}

module attributes {stable_mosaic.version = 11 : i64} {
  func.func @_mlp_kernel(%arg0: i32, %arg1: memref<16x32xf32, #tpu.memory_space<vmem>>, %arg2: memref<32x128xf32, #tpu.memory_space<vmem>>, %arg3: memref<1x128xf32, #tpu.memory_space<vmem>>, %arg4: memref<128x32xf32, #tpu.memory_space<vmem>>, %arg5: memref<1x32xf32, #tpu.memory_space<vmem>>, %arg6: memref<16x32xf32, #tpu.memory_space<vmem>>) attributes {dimension_semantics = [#tpu.dimension_semantics<parallel>], iteration_bounds = array<i64: 1>, scalar_prefetch = 0 : i64, scratch_operands = 0 : i64, tpu.core_type = #tpu.core_type<tc>, window_params = [{transform_indices = @transform_0, window_bounds = array<i64: 16, 32>}, {pipeline_mode = #tpu.pipeline_mode<synchronous>, transform_indices = @transform_1, window_bounds = array<i64: 32, 128>}, {pipeline_mode = #tpu.pipeline_mode<synchronous>, transform_indices = @transform_2, window_bounds = array<i64: 1, 128>}, {pipeline_mode = #tpu.pipeline_mode<synchronous>, transform_indices = @transform_3, window_bounds = array<i64: 128, 32>}, {pipeline_mode = #tpu.pipeline_mode<synchronous>, transform_indices = @transform_4, window_bounds = array<i64: 1, 32>}, {transform_indices = @transform_5, window_bounds = array<i64: 16, 32>}]} {
    %c0 = arith.constant 0 : index
    %c0_0 = arith.constant 0 : index
    %0 = vector.load %arg1[%c0, %c0_0] : memref<16x32xf32, #tpu.memory_space<vmem>>, vector<16x32xf32>
    %c0_1 = arith.constant 0 : index
    %c0_2 = arith.constant 0 : index
    %1 = vector.load %arg2[%c0_1, %c0_2] : memref<32x128xf32, #tpu.memory_space<vmem>>, vector<32x128xf32>
    %cst = arith.constant dense<0.000000e+00> : vector<16x128xf32>
    %2 = tpu.matmul %0, %1, %cst {dimension_numbers = #tpu.dot_dimension_numbers<[1], [0], [0], [1], [0, 0, 1, 1], [], []>} : vector<16x32xf32>, vector<32x128xf32>, vector<16x128xf32> -> vector<16x128xf32>
    %c0_3 = arith.constant 0 : index
    %c0_4 = arith.constant 0 : index
    %3 = vector.load %arg3[%c0_3, %c0_4] : memref<1x128xf32, #tpu.memory_space<vmem>>, vector<1x128xf32>
    %4 = vector.broadcast %3 : vector<1x128xf32> to vector<16x128xf32>
    %5 = arith.addf %2, %4 : vector<16x128xf32>
    %6 = math.absf %5 : vector<16x128xf32>
    %cst_5 = arith.constant 0.707106769 : f32
    %7 = vector.broadcast %cst_5 : f32 to vector<16x128xf32>
    %8 = arith.mulf %6, %7 : vector<16x128xf32>
    %cst_6 = arith.constant 0.327591091 : f32
    %9 = vector.broadcast %cst_6 : f32 to vector<16x128xf32>
    %10 = arith.mulf %9, %8 : vector<16x128xf32>
    %cst_7 = arith.constant 1.000000e+00 : f32
    %11 = vector.broadcast %cst_7 : f32 to vector<16x128xf32>
    %12 = arith.addf %11, %10 : vector<16x128xf32>
    %13 = tpu.reciprocal %12 {approx = true} : vector<16x128xf32> -> vector<16x128xf32>
    %14 = arith.mulf %12, %13 : vector<16x128xf32>
    %cst_8 = arith.constant 2.000000e+00 : f32
    %15 = vector.broadcast %cst_8 : f32 to vector<16x128xf32>
    %16 = arith.subf %15, %14 : vector<16x128xf32>
    %17 = arith.mulf %13, %16 : vector<16x128xf32>
    %cst_9 = arith.constant 1.06140542 : f32
    %18 = vector.broadcast %cst_9 : f32 to vector<16x128xf32>
    %19 = arith.mulf %18, %17 : vector<16x128xf32>
    %cst_10 = arith.constant -1.45315206 : f32
    %20 = vector.broadcast %cst_10 : f32 to vector<16x128xf32>
    %21 = arith.addf %19, %20 : vector<16x128xf32>
    %22 = arith.mulf %21, %17 : vector<16x128xf32>
    %cst_11 = arith.constant 1.42141378 : f32
    %23 = vector.broadcast %cst_11 : f32 to vector<16x128xf32>
    %24 = arith.addf %22, %23 : vector<16x128xf32>
    %25 = arith.mulf %24, %17 : vector<16x128xf32>
    %cst_12 = arith.constant -0.284496725 : f32
    %26 = vector.broadcast %cst_12 : f32 to vector<16x128xf32>
    %27 = arith.addf %25, %26 : vector<16x128xf32>
    %28 = arith.mulf %27, %17 : vector<16x128xf32>
    %cst_13 = arith.constant 0.254829586 : f32
    %29 = vector.broadcast %cst_13 : f32 to vector<16x128xf32>
    %30 = arith.addf %28, %29 : vector<16x128xf32>
    %31 = arith.mulf %30, %17 : vector<16x128xf32>
    %cst_14 = arith.constant -5.000000e-01 : f32
    %32 = vector.broadcast %cst_14 : f32 to vector<16x128xf32>
    %33 = arith.mulf %32, %5 : vector<16x128xf32>
    %34 = arith.mulf %33, %5 : vector<16x128xf32>
    %35 = math.exp %34 : vector<16x128xf32>
    %36 = arith.mulf %31, %35 : vector<16x128xf32>
    %cst_15 = arith.constant 0.000000e+00 : f32
    %37 = vector.broadcast %cst_15 : f32 to vector<16x128xf32>
    %38 = arith.cmpf oge, %5, %37 : vector<16x128xf32>
    %cst_16 = arith.constant 2.000000e+00 : f32
    %39 = vector.broadcast %cst_16 : f32 to vector<16x128xf32>
    %40 = arith.subf %39, %36 : vector<16x128xf32>
    %41 = arith.select %38, %40, %36 : vector<16x128xi1>, vector<16x128xf32>
    %cst_17 = arith.constant 5.000000e-01 : f32
    %42 = vector.broadcast %cst_17 : f32 to vector<16x128xf32>
    %43 = arith.mulf %42, %5 : vector<16x128xf32>
    %44 = arith.mulf %43, %41 : vector<16x128xf32>
    %c0_18 = arith.constant 0 : index
    %c0_19 = arith.constant 0 : index
    %45 = vector.load %arg4[%c0_18, %c0_19] : memref<128x32xf32, #tpu.memory_space<vmem>>, vector<128x32xf32>
    %cst_20 = arith.constant dense<0.000000e+00> : vector<16x32xf32>
    %46 = tpu.matmul %44, %45, %cst_20 {dimension_numbers = #tpu.dot_dimension_numbers<[1], [0], [0], [1], [0, 0, 1, 1], [], []>} : vector<16x128xf32>, vector<128x32xf32>, vector<16x32xf32> -> vector<16x32xf32>
    %c0_21 = arith.constant 0 : index
    %c0_22 = arith.constant 0 : index
    %47 = vector.load %arg5[%c0_21, %c0_22] : memref<1x32xf32, #tpu.memory_space<vmem>>, vector<1x32xf32>
    %48 = vector.broadcast %47 : vector<1x32xf32> to vector<16x32xf32>
    %49 = arith.addf %46, %48 : vector<16x32xf32>
    %c0_23 = arith.constant 0 : index
    %c0_24 = arith.constant 0 : index
    %50 = vector.load %arg6[%c0_23, %c0_24] : memref<16x32xf32, #tpu.memory_space<vmem>>, vector<16x32xf32>
    tpu.vector_store %arg6[%c0_23, %c0_24], %49 {strides = array<i32>} : memref<16x32xf32, #tpu.memory_space<vmem>>, vector<16x32xf32>,
    return
  }
  func.func @transform_0(%arg0: i32) -> (i32, i32) {
    %c0_i32 = arith.constant 0 : i32
    %c0_i32_0 = arith.constant 0 : i32
    return %arg0, %c0_i32 : i32, i32
  }
  func.func @transform_1(%arg0: i32) -> (i32, i32) {
    %c0_i32 = arith.constant 0 : i32
    %c0_i32_0 = arith.constant 0 : i32
    %c0_i32_1 = arith.constant 0 : i32
    return %c0_i32, %c0_i32_0 : i32, i32
  }
  func.func @transform_2(%arg0: i32) -> (i32, i32) {
    %c0_i32 = arith.constant 0 : i32
    %c0_i32_0 = arith.constant 0 : i32
    %c0_i32_1 = arith.constant 0 : i32
    return %c0_i32, %c0_i32_0 : i32, i32
  }
  func.func @transform_3(%arg0: i32) -> (i32, i32) {
    %c0_i32 = arith.constant 0 : i32
    %c0_i32_0 = arith.constant 0 : i32
    %c0_i32_1 = arith.constant 0 : i32
    return %c0_i32, %c0_i32_0 : i32, i32
  }
  func.func @transform_4(%arg0: i32) -> (i32, i32) {
    %c0_i32 = arith.constant 0 : i32
    %c0_i32_0 = arith.constant 0 : i32
    %c0_i32_1 = arith.constant 0 : i32
    return %c0_i32, %c0_i32_0 : i32, i32
  }
  func.func @transform_5(%arg0: i32) -> (i32, i32) {
    %c0_i32 = arith.constant 0 : i32
    %c0_i32_0 = arith.constant 0 : i32
    return %arg0, %c0_i32 : i32, i32
  }
}

</mosaic_0001>

<bundles_post_ra>
// kernel: tpu_custom_call.1
= control target key start
LH: loop header
LB: loop body
LE: loop exit
PB: predicated region body
PF: predicated region fallthrough
CT: control target
= control target key end

     0   :  { %vm34_vm0 = vcmask 261120   ;;  %s556_s0 = inlined_call_operand.vmem [shape: f32[16,32], index: 0, kind: input, shape index: {}]   ;;  %s557_s1 = inlined_call_operand.vmem [shape: f32[32,128], index: 1, kind: input, shape index: {}]   ;;  %s558_s2 = inlined_call_operand.vmem [shape: f32[1,128], index: 2, kind: input, shape index: {}]   ;;  %s559_s3 = inlined_call_operand.vmem [shape: f32[128,32], index: 3, kind: input, shape index: {}]   ;;  %s560_s4 = inlined_call_operand.vmem [shape: f32[1,32], index: 4, kind: input, shape index: {}]   ;;  %s561_s5 = inlined_call_operand.hbm [shape: f32[16,32], index: 5, kind: output, shape index: {}]  }
   0x1   :  { %v23_v0 = vld [vmem:[%s557_s1] sm:$0xff]  ;;  %v24_v1 = vld [vmem:[%s557_s1 + $0x8] sm:$0xff]  ;;  %v25_v2 = vld [vmem:[%s557_s1 + $0x10] sm:$0xff] }
   0x2   :  { %v360_v3 = vpack.c.bf16 %v24_v1, %v23_v0  ;;  %v26_v4 = vld [vmem:[%s557_s1 + $0x18] sm:$0xff]  ;;  %v21_v5 = vld [vmem:[%s556_s0] sm:$0xff] }
   0x3   :  { %v364_v6 = vpack.c.bf16 %v26_v4, %v25_v2  ;;  %322 = vmatprep.mubr.msk.f32.mxu0 %vm34_vm0, %v21_v5 }
   0x4   :  { %10 = vsyncpa [#allocation3], 0  ;;  %361 = vmatprep.subr.bf16.mxu0 %v360_v3  ;;  %v22_v7 = vld [vmem:[%s556_s0 + $0x8] sm:$0xff]  ;;  %v170_v8 = vld [vmem:[%s559_s3] sm:$0xff]  ;;  %s435_s11 = smov [#allocation2]  }
   0x5   :  { %363 = vmatpush3.bf16.msra.mxu0 %v360_v3  ;;  %v171_v9 = vld [vmem:[%s559_s3 + $0x8] sm:$0xff]  ;;  %v172_v11 = vld [vmem:[%s559_s3 + $0x10] sm:$0xff]  ;;  %v173_v12 = vld [vmem:[%s559_s3 + $0x18] sm:$0xff]  ;;  %s275_s0 = sshll.u32 %s435_s11, 4  ;;  %s276_s0 = int_to_ptr.vmem [resolvable:$true] %s275_s0 }
   0x6   :  { %365 = vmatprep.subr.bf16.mxu0 %v364_v6  ;;  %v368_v10 = vpack.c.bf16 %v171_v9, %v170_v8  ;;  %v372_v13 = vpack.c.bf16 %v173_v12, %v172_v11  ;;  %v174_v14 = vld [vmem:[%s559_s3 + $0x20] sm:$0xff]  ;;  %v175_v15 = vld [vmem:[%s559_s3 + $0x28] sm:$0xff]  ;;  %v176_v16 = vld [vmem:[%s559_s3 + $0x30] sm:$0xff]  ;;  %s411_s12 = scalar_lea.vmem %s276_s0, 256  ;;  %p416_p1 = scmp.lt.s32.totalorder %s276_s0, %s276_s0 }
   0x7   :  { %v376_v17 = vpack.c.bf16 %v175_v15, %v174_v14  ;;  %v177_v18 = vld [vmem:[%s559_s3 + $0x38] sm:$0xff]  ;;  %v178_v20 = vld [vmem:[%s559_s3 + $0x40] sm:$0xff]  ;;  %v179_v21 = vld [vmem:[%s559_s3 + $0x48] sm:$0xff]  ;;  %p412_p0 = scmp.ne.s32.totalorder %s276_s0, %s411_s12  ;;  %p417_p2 = scmp.lt.s32.totalorder %s411_s12, %s411_s12 }
   0x8   :  { %369 = vmatprep.subr.bf16.mxu1 %v368_v10  ;;  %v380_v19 = vpack.c.bf16 %v177_v18, %v176_v16  ;;  %v384_v22 = vpack.c.bf16 %v179_v21, %v178_v20  ;;  %v180_v23 = vld [vmem:[%s559_s3 + $0x50] sm:$0xff]  ;;  %v181_v24 = vld [vmem:[%s559_s3 + $0x58] sm:$0xff]  ;;  %v182_v26 = vld [vmem:[%s559_s3 + $0x60] sm:$0xff] }
   0x9   :  { %367 = vmatpush3.bf16.msra.mxu0 %v364_v6  ;;  %371 = vmatpush3.bf16.msra.mxu1 %v368_v10  ;;  %v388_v25 = vpack.c.bf16 %v181_v24, %v180_v23  ;;  %v183_v27 = vld [vmem:[%s559_s3 + $0x68] sm:$0xff]  ;;  %v184_v29 = vld [vmem:[%s559_s3 + $0x70] sm:$0xff]  ;;  %v185_v30 = vld [vmem:[%s559_s3 + $0x78] sm:$0xff]  ;;  %p418_p3 = por %p417_p2, %p416_p1 }
   0xa   :  { %373 = vmatprep.subr.bf16.mxu1 %v372_v13  ;;  %v392_v28 = vpack.c.bf16 %v183_v27, %v182_v26  ;;  %v396_v31 = vpack.c.bf16 %v185_v30, %v184_v29  ;;  %v286_v32 = vld [vmem:[%s558_s2] ss:$0 sm:$0xff] }
   0xb   :  { %p419_p4 = pnand %p418_p3, %p412_p0 }
   0xc   :  { %323 = vmatmul.mubr.msk.f32.vlgmr.msra.gmra.mrb[0].mxu0 %vm34_vm0, %v22_v7 }
   0xd   :  { %375 = vmatpush3.bf16.msra.mxu1 %v372_v13 }
   0xe   :  { %377 = vmatprep.subr.bf16.mxu1 %v376_v17 }
  0x11   :  { %379 = vmatpush3.bf16.msra.mxu1 %v376_v17 }
  0x12   :  { %381 = vmatprep.subr.bf16.mxu1 %v380_v19 }
  0x15   :  { %383 = vmatpush3.bf16.msra.mxu1 %v380_v19 }
  0x16   :  { %385 = vmatprep.subr.bf16.mxu1 %v384_v22 }
  0x19   :  { %387 = vmatpush3.bf16.msra.mxu1 %v384_v22 }
  0x1a   :  { %389 = vmatprep.subr.bf16.mxu1 %v388_v25 }
  0x1d   :  { %391 = vmatpush3.bf16.msra.mxu1 %v388_v25  ;;  %v289_v25 = vld [vmem:[%s560_s4] ss:$0 sm:$0xff] }
  0x1e   :  { %393 = vmatprep.subr.bf16.mxu1 %v392_v28 }
  0x21   :  { %395 = vmatpush3.bf16.msra.mxu1 %v392_v28 }
  0x22   :  { %397 = vmatprep.subr.bf16.mxu1 %v396_v31 }
  0x25   :  { %399 = vmatpush3.bf16.msra.mxu1 %v396_v31 }
  0xdf   :  { %v324_v33 = vpop.f32.mrb[0].mxu0 }
  0xe0   :  { %v113_v34 = vadd.f32 %v324_v33, %v286_v32  ;;  %v107_v35 = vpop.f32.mrb[1].mxu0 }
  0xe1   :  { %v108_v36 = vadd.f32 %v286_v32, %v107_v35 }
  0xe2   :  { %v117_v37 = vand.u32 2147483647, %v113_v34  ;;  %v151_v48 = vmul.f32 -0.5, %v113_v34  ;;  %vm161_vm1 = vcmp.ge.f32.partialorder %v113_v34, 0.0  ;;  %v167_v22 = vmul.f32 0.5, %v113_v34 }
  0xe3   :  { %v116_v38 = vand.u32 2147483647, %v108_v36  ;;  %v150_v51 = vmul.f32 -0.5, %v108_v36  ;;  %vm160_vm2 = vcmp.ge.f32.partialorder %v108_v36, 0.0  ;;  %v166_v19 = vmul.f32 0.5, %v108_v36 }
  0xe4   :  { %v119_v39 = vmul.f32 0.70710677, %v117_v37  ;;  %v153_v54 = vmul.f32 %v151_v48, %v113_v34 }
  0xe5   :  { %v118_v40 = vmul.f32 0.70710677, %v116_v38  ;;  %v152_v56 = vmul.f32 %v150_v51, %v108_v36 }
  0xe6   :  { %v121_v41 = vmul.f32 0.3275911, %v119_v39  ;;  %v156_v60 = vmul.f32 1.442695, %v153_v54 }
  0xe7   :  { %v120_v42 = vmul.f32 0.3275911, %v118_v40  ;;  %v154_v62 = vmul.f32 1.442695, %v152_v56 }
  0xe8   :  { %v123_v43 = vadd.f32 1.0, %v121_v41 }
  0xe9   :  { %v122_v44 = vadd.f32 1.0, %v120_v42 }
  0xea   :  { %403 = vrcp.f32 %v123_v43 }
  0xeb   :  { %405 = vrcp.f32 %v122_v44 }
  0xec   :  { %407 = vpow2.f32 %v156_v60 }
  0xed   :  { %409 = vpow2.f32 %v154_v62 }
  0xf4   :  { %v404_v45 = vpop.eup %403 }
  0xf5   :  { %v406_v46 = vpop.eup %405  ;;  %v127_v47 = vmul.f32 %v404_v45, %v123_v43 }
  0xf6   :  { %v126_v49 = vmul.f32 %v406_v46, %v122_v44  ;;  %v408_v12 = vpop.eup %407 }
  0xf7   :  { %v129_v50 = vsub.f32 2.0, %v127_v47  ;;  %v410_v14 = vpop.eup %409 }
  0xf8   :  { %v128_v52 = vsub.f32 2.0, %v126_v49 }
  0xf9   :  { %v131_v53 = vmul.f32 %v404_v45, %v129_v50 }
  0xfa   :  { %v130_v55 = vmul.f32 %v406_v46, %v128_v52 }
  0xfb   :  { %v133_v57 = vmul.f32 1.0614054, %v131_v53 }
  0xfc   :  { %v132_v58 = vmul.f32 1.0614054, %v130_v55 }
  0xfd   :  { %v135_v59 = vadd.f32 -1.4531521, %v133_v57 }
  0xfe   :  { %v134_v61 = vadd.f32 -1.4531521, %v132_v58 }
  0xff   :  { %v137_v63 = vmul.f32 %v135_v59, %v131_v53 }
 0x100   :  { %v136_v0 = vmul.f32 %v134_v61, %v130_v55 }
 0x101   :  { %v139_v1 = vadd.f32 1.4214138, %v137_v63 }
 0x102   :  { %v138_v2 = vadd.f32 1.4214138, %v136_v0 }
 0x103   :  { %v141_v3 = vmul.f32 %v139_v1, %v131_v53 }
 0x104   :  { %v140_v4 = vmul.f32 %v138_v2, %v130_v55 }
 0x105   :  { %v143_v5 = vadd.f32 -0.28449672, %v141_v3 }
 0x106   :  { %v142_v6 = vadd.f32 -0.28449672, %v140_v4 }
 0x107   :  { %v145_v7 = vmul.f32 %v143_v5, %v131_v53 }
 0x108   :  { %v144_v8 = vmul.f32 %v142_v6, %v130_v55 }
 0x109   :  { %v147_v9 = vadd.f32 0.2548296, %v145_v7 }
 0x10a   :  { %v146_v10 = vadd.f32 0.2548296, %v144_v8 }
 0x10b   :  { %v149_v11 = vmul.f32 %v147_v9, %v131_v53 }
 0x10c   :  { %v148_v13 = vmul.f32 %v146_v10, %v130_v55 }
 0x10d   :  { %v159_v15 = vmul.f32 %v408_v12, %v149_v11 }
 0x10e   :  { %v158_v16 = vmul.f32 %v410_v14, %v148_v13 }
 0x10f   :  { %v163_v17 = vsub.f32 2.0, %v159_v15 }
 0x110   :  { %v162_v18 = vsub.f32 2.0, %v158_v16 }
 0x111   :  { %v165_v20 = vsel %vm161_vm1, %v163_v17, %v159_v15 }
 0x112   :  { %v164_v21 = vsel %vm160_vm2, %v162_v18, %v158_v16  ;;  %v169_v24 = vmul.f32 %v167_v22, %v165_v20 }
 0x113   :  { %v168_v23 = vmul.f32 %v166_v19, %v164_v21 }
 0x115   :  { %357 = vmatprep.mubr.f32.mxu1 %v168_v23 }
 0x116   :  { %358 = vmatmul.mubr.f32.vlgmr.msra.gmra.mrb[0].mxu1 %v169_v24 }
 0x1e9   :  { %v359_v26 = vpop.f32.mrb[0].mxu1 }
 0x1ea   :  { %v265_v27 = vadd.f32 %v359_v26, %v289_v25  ;;  %v259_v28 = vpop.f32.mrb[1].mxu1 }
 0x1eb   :  { %v260_v29 = vadd.f32 %v289_v25, %v259_v28 }
 0x1ec   :  { %269 = vst.msk [vmem:[#allocation2 + $0x8] sm:$0xff] %vm34_vm0, %v265_v27 }
 0x1ed   :  { %268 = vst.msk [vmem:[#allocation2] sm:$0xff] %vm34_vm0, %v260_v29 }
 0x1ee   :  { %422 = shalt.err (!%p419_p4)
}
 0x1ef   :  { %s423_s14 = scalar_lea.hbm %s561_s5, 256 }
 0x1f0   :  { %p424_p5 = scmp.ne.s32.totalorder %s561_s5, %s423_s14  ;;  %p427_p6 = scmp.lt.u32.totalorder %s423_s14, %s561_s5 }
 0x1f2   :  { %p429_p7 = pnand %p427_p6, %p424_p5 }
 0x1f4   :  { %432 = shalt.err (!%p429_p7)
}
 0x1f5   :  { %s436_s19 = smov 128   ;;  %s437_s20 = smov 8  }
 0x1f6   :  { %281 = dma.vmem_to_hbm [thread:$0]  %s276_s0, 256, %s561_s5, [#allocation3], %s436_s19, %s436_s19, %s437_s20  }
 0x1f7   :  { %433 = dma.done.wait [#allocation3], 256  }
 0x1f8   :  { %434 = vsyncadd [#allocation3], 4294967040 }
 0x1f9   :  { %285 = vsyncpa [#allocation3], 1 }

</bundles_post_ra>
